<compile_context>
chip_gen: v7x
topology: tpu7x:2x2x1
jax: 0.10.0
libtpu: 0.0.40
codegen_flags: <defaults>
</compile_context>

<pallas_src>
import jax
import jax.numpy as jnp
from jax.experimental import pallas as pl
from jax.experimental.pallas import tpu as pltpu


def _rowwise_linear_kernel(x_ref, w_ref, o_ref):
    # x_ref: (TH, TB, W); w_ref: (TH, W, TO); o_ref: (TH, TB, TO)
    # Batched matmul over the row axis; dot_general's natural output order
    # (batch, lhs_free, rhs_free) == (h, b, o) matches the output block, so no
    # in-kernel transpose is generated.
    y = jnp.einsum(
        "hbw,hwo->hbo",
        x_ref[...],
        w_ref[...],
        preferred_element_type=jnp.float32,
    )
    o_ref[...] = y.astype(o_ref.dtype)


def _vmem_limit_bytes():
    """Scoped-VMEM limit to request, with a conservative fallback."""
    try:
        cap = int(pltpu.get_tpu_info().vmem_capacity_bytes)
    except Exception:
        cap = 64 * 1024 * 1024  # v7x per-TC capacity: safe lower bound
    # ~80% of physical, always leaving >= 8 MiB headroom; never below the
    # stock 32 MiB default.
    return max(32 * 1024 * 1024, min(int(cap * 0.8), cap - (8 << 20)))


def _largest_divisor(n, cap, align=1):
    """Largest divisor of n that is <= cap and a multiple of `align`.

    Full extent (n itself) is always allowed regardless of alignment.
    Returns None if no divisor qualifies.
    """
    if n <= cap:
        return n
    best = None
    d = 1
    while d * d <= n:
        if n % d == 0:
            for c in (d, n // d):
                if c <= cap and c % align == 0 and (best is None or c > best):
                    best = c
        d += 1
    return best


def _choose_blocks(H, B, W, O, x_itemsize, w_itemsize, budget_bytes):
    """Pick (TH, TB, TO) so one block set fits the VMEM budget."""
    tb, to = B, O

    def per_row(tb_, to_):
        # bytes of one h-row's worth of x block + w block + y block
        return tb_ * W * x_itemsize + W * to_ * w_itemsize + tb_ * to_ * x_itemsize

    # If even a single row at full B/O extent blows the budget, tile O
    # (lane-aligned, multiple of 128) and then B (sublane-aligned, multiple
    # of 8).  Correctness never depends on these choices.
    if per_row(tb, to) > budget_bytes:
        cand = _largest_divisor(O, 2048, align=128)
        if cand is not None:
            to = cand
    if per_row(tb, to) > budget_bytes:
        cand = _largest_divisor(B, 1024, align=8)
        if cand is not None:
            tb = cand
    # TODO(synk): for very large W add a trailing "arbitrary" K axis with an
    # f32 VMEM accumulator (pl.when init/finalize) instead of full-extent W.

    # As many rows per grid step as fit: every row is streamed exactly once
    # either way, so bigger TH only amortizes per-step overhead.
    cap_th = max(1, budget_bytes // max(1, per_row(tb, to)))
    th = _largest_divisor(H, cap_th)  # align=1 -> always succeeds (>= 1)
    return th, tb, to


def rowwise_linear(x, weights):
    """x: (batch, height, width); weights: (height, out_width, width)
    returns (batch, height, out_width).  Matches RowWiseLinear.forward."""
    B, H, W = x.shape
    Hw, O, Ww = weights.shape
    assert H == Hw and W == Ww, (x.shape, weights.shape)

    # Layout glue.  NOTE: if callers can natively hold activations as
    # (H, B, W) and weights as (H, W, O), drop these transposes -- on a
    # mem-bound op each activation transpose is a full extra HBM read+write.
    # The weight transpose is a one-time cost for static parameters.
    x_hbw = jnp.transpose(x, (1, 0, 2))        # (H, B, W)
    w_hwo = jnp.transpose(weights, (0, 2, 1))  # (H, W, O), O on the lane axis

    vmem_limit = _vmem_limit_bytes()
    # Room for double-buffered inputs + outputs inside the scoped limit.
    block_budget = vmem_limit // 3
    th, tb, to = _choose_blocks(
        H, B, W, O, x.dtype.itemsize, weights.dtype.itemsize, block_budget)

    grid = (H // th, B // tb, O // to)

    y_hbo = pl.pallas_call(
        _rowwise_linear_kernel,
        out_shape=jax.ShapeDtypeStruct((H, B, O), x.dtype),
        grid_spec=pltpu.PrefetchScalarGridSpec(
            num_scalar_prefetch=0,
            grid=grid,
            in_specs=[
                # x block index is constant across the innermost O axis, so
                # Pallas fetches it once per (h, b); weights (zero reuse)
                # stream fresh every step.  If DMA is still exposed, add
                # pipeline_mode=pl.Buffered(3) to the weight spec.
                pl.BlockSpec((th, tb, W), lambda h, b, o: (h, b, 0)),
                pl.BlockSpec((th, W, to), lambda h, b, o: (h, 0, o)),
            ],
            out_specs=pl.BlockSpec((th, tb, to), lambda h, b, o: (h, b, o)),
        ),
        compiler_params=pltpu.CompilerParams(
            # All grid axes are independent (W un-tiled): lets the grid shard
            # across both TensorCores on v7x; near-neutral on v5e/v6e.
            dimension_semantics=("parallel", "parallel", "parallel"),
            vmem_limit_bytes=int(vmem_limit),
        ),
    )(x_hbw, w_hwo)

    return jnp.transpose(y_hbo, (1, 0, 2))     # (B, H, O)


if __name__ == "__main__":
    # Small shapes consistent with the module's forward.
    batch, height, width, out_width = 8, 4, 32, 32

    key = jax.random.PRNGKey(0)
    kx, kw = jax.random.split(key)

    x = jax.random.normal(kx, (batch, height, width), dtype=jnp.float32)

    # Deterministic init matching nn.init.uniform_(-sqrt(1/out_width), sqrt(1/out_width))
    bound = (1.0 / out_width) ** 0.5
    weights = jax.random.uniform(
        kw, (height, out_width, width), dtype=jnp.float32,
        minval=-bound, maxval=bound,
    )

    y = rowwise_linear(x, weights)
    y = jax.block_until_ready(y)

    # Reference: y[b,h,:] = weights[h] @ x[b,h,:]
    y_ref = jnp.einsum("how,bhw->bho", weights, x)
    assert y.shape == (batch, height, out_width)
    assert jnp.allclose(y, y_ref, atol=1e-5, rtol=1e-5)

    print("KERNEL_OK")
</pallas_src>

<mosaic_0001>
module attributes {stable_mosaic.version = 11 : i64} {
  func.func @_rowwise_linear_kernel(%arg0: i32, %arg1: i32, %arg2: i32, %arg3: memref<4x8x32xf32, #tpu.memory_space<vmem>>, %arg4: memref<4x32x32xf32, #tpu.memory_space<vmem>>, %arg5: memref<4x8x32xf32, #tpu.memory_space<vmem>>) attributes {dimension_semantics = [#tpu.dimension_semantics<parallel>, #tpu.dimension_semantics<parallel>, #tpu.dimension_semantics<parallel>], iteration_bounds = array<i64: 1, 1, 1>, scalar_prefetch = 0 : i64, scratch_operands = 0 : i64, tpu.core_type = #tpu.core_type<tc>, window_params = [{transform_indices = @transform_0, window_bounds = array<i64: 4, 8, 32>}, {transform_indices = @transform_1, window_bounds = array<i64: 4, 32, 32>}, {transform_indices = @transform_2, window_bounds = array<i64: 4, 8, 32>}]} {
    %c0 = arith.constant 0 : index
    %c0_0 = arith.constant 0 : index
    %c0_1 = arith.constant 0 : index
    %0 = vector.load %arg3[%c0, %c0_0, %c0_1] : memref<4x8x32xf32, #tpu.memory_space<vmem>>, vector<4x8x32xf32>
    %c0_2 = arith.constant 0 : index
    %c0_3 = arith.constant 0 : index
    %c0_4 = arith.constant 0 : index
    %1 = vector.load %arg4[%c0_2, %c0_3, %c0_4] : memref<4x32x32xf32, #tpu.memory_space<vmem>>, vector<4x32x32xf32>
    "tpu.trace_start"() <{level = 10 : i32, message = "hbw,hwo->hbo"}> : () -> ()
    %cst = arith.constant dense<0.000000e+00> : vector<4x8x32xf32>
    %2 = tpu.matmul %0, %1, %cst {dimension_numbers = #tpu.dot_dimension_numbers<[2], [1], [1], [2], [0, 0, 0, 1, 1, 2], [0], [0]>} : vector<4x8x32xf32>, vector<4x32x32xf32>, vector<4x8x32xf32> -> vector<4x8x32xf32>
    "tpu.trace_stop"() : () -> ()
    %c0_5 = arith.constant 0 : index
    %c0_6 = arith.constant 0 : index
    %c0_7 = arith.constant 0 : index
    %3 = vector.load %arg5[%c0_5, %c0_6, %c0_7] : memref<4x8x32xf32, #tpu.memory_space<vmem>>, vector<4x8x32xf32>
    tpu.vector_store %arg5[%c0_5, %c0_6, %c0_7], %2 {strides = array<i32>} : memref<4x8x32xf32, #tpu.memory_space<vmem>>, vector<4x8x32xf32>,
    return
  }
  func.func @transform_0(%arg0: i32, %arg1: i32, %arg2: i32) -> (i32, i32, i32) {
    %c0_i32 = arith.constant 0 : i32
    %c0_i32_0 = arith.constant 0 : i32
    return %arg0, %arg1, %c0_i32 : i32, i32, i32
  }
  func.func @transform_1(%arg0: i32, %arg1: i32, %arg2: i32) -> (i32, i32, i32) {
    %c0_i32 = arith.constant 0 : i32
    %c0_i32_0 = arith.constant 0 : i32
    return %arg0, %c0_i32, %arg2 : i32, i32, i32
  }
  func.func @transform_2(%arg0: i32, %arg1: i32, %arg2: i32) -> (i32, i32, i32) {
    %c0_i32 = arith.constant 0 : i32
    return %arg0, %arg1, %arg2 : i32, i32, i32
  }
}

</mosaic_0001>

<bundles_post_ra>
// kernel: tpu_custom_call.1
= control target key start
LH: loop header
LB: loop body
LE: loop exit
PB: predicated region body
PF: predicated region fallthrough
CT: control target
= control target key end

     0   :  { %7 = vsyncpa [#allocation3], 0  ;;  %s627_s0 = inlined_call_operand.hbm [shape: f32[4,8,32], index: 0, kind: input, shape index: {}]   ;;  %s628_s1 = inlined_call_operand.hbm [shape: f32[4,32,32], index: 1, kind: input, shape index: {}]   ;;  %s629_s2 = inlined_call_operand.hbm [shape: f32[4,8,32], index: 2, kind: output, shape index: {}]  }
   0x1   :  { %8 = vsyncpa [#allocation6], 0 }
   0x2   :  { %9 = vsyncpa [#allocation4], 0  ;;  %s547_s9 = smov [#allocation2]   ;;  %s475_s13 = scalar_lea.hbm %s627_s0, 512 }
   0x3   :  { %s15_s10 = sshll.u32 %s547_s9, 4  ;;  %p476_p0 = scmp.ne.s32.totalorder %s627_s0, %s475_s13  ;;  %s16_s10 = int_to_ptr.vmem [resolvable:$true] %s15_s10 }
   0x4   :  { %p479_p1 = scmp.lt.u32.totalorder %s475_s13, %s627_s0 }
   0x6   :  { %p481_p2 = pnand %p479_p1, %p476_p0 }
   0x8   :  { %484 = shalt.err (!%p481_p2)
}
   0x9   :  { %s485_s18 = scalar_lea.vmem %s16_s10, 512  ;;  %p490_p4 = scmp.lt.s32.totalorder %s16_s10, %s16_s10 }
   0xa   :  { %p486_p3 = scmp.ne.s32.totalorder %s16_s10, %s485_s18  ;;  %p491_p5 = scmp.lt.s32.totalorder %s485_s18, %s485_s18 }
   0xc   :  { %p492_p6 = por %p491_p5, %p490_p4 }
   0xe   :  { %p493_p7 = pnand %p492_p6, %p486_p3 }
  0x10   :  { %496 = shalt.err (!%p493_p7)
}
  0x11   :  { %s548_s19 = smov 128   ;;  %s549_s20 = smov 8  }
  0x12   :  { %21 = dma.hbm_to_vmem [thread:$0]  %s627_s0, 512, %s16_s10, [#allocation3], %s548_s19, %s548_s19, %s549_s20  }
  0x13   :  { %s550_s23 = smov [#allocation5]   ;;  %s497_s27 = scalar_lea.hbm %s628_s1, 2048 }
  0x14   :  { %s27_s24 = sshll.u32 %s550_s23, 4  ;;  %p498_p8 = scmp.ne.s32.totalorder %s628_s1, %s497_s27  ;;  %s28_s24 = int_to_ptr.vmem [resolvable:$true] %s27_s24 }
  0x15   :  { %p501_p9 = scmp.lt.u32.totalorder %s497_s27, %s628_s1 }
  0x17   :  { %p503_p10 = pnand %p501_p9, %p498_p8 }
  0x19   :  { %506 = shalt.err (!%p503_p10)
}
  0x1a   :  { %s507_s4 = scalar_lea.vmem %s28_s24, 2048  ;;  %p512_p12 = scmp.lt.s32.totalorder %s28_s24, %s28_s24 }
  0x1b   :  { %p508_p11 = scmp.ne.s32.totalorder %s28_s24, %s507_s4  ;;  %p513_p13 = scmp.lt.s32.totalorder %s507_s4, %s507_s4 }
  0x1d   :  { %p514_p0 = por %p513_p13, %p512_p12 }
  0x1f   :  { %p515_p1 = pnand %p514_p0, %p508_p11 }
  0x21   :  { %518 = shalt.err (!%p515_p1)
}
  0x22   :  { %33 = dma.hbm_to_vmem [thread:$0]  %s628_s1, 2048, %s28_s24, [#allocation6], %s548_s19, %s548_s19, %s549_s20  }
  0x23   :  { %541 = dma.done.wait [#allocation3], 512  }
  0x24   :  { %542 = vsyncadd [#allocation3], 4294966784 }
  0x25   :  { %543 = dma.done.wait [#allocation6], 2048  }
  0x26   :  { %544 = vsyncadd [#allocation6], 4294965248  ;;  %v551_v0 = vmov 0.0|0.0   ;;  %vm552_vm0 = vmmov 0   ;;  %v553_v1 = vmov 0.0   ;;  %v44_v2 = vld [vmem:[#allocation5] sm:$0xff] }
  0x27   :  { %443 = vmatprep.subr.bf16.mxu0 %v551_v0  ;;  %449 = vmatprep.subr.bf16.mxu1 %v551_v0  ;;  %v45_v3 = vld [vmem:[#allocation5 + $0x8] sm:$0xff]  ;;  %v48_v4 = vld [vmem:[#allocation5 + $0x20] sm:$0xff]  ;;  %v46_v7 = vld [vmem:[#allocation5 + $0x10] sm:$0xff]  ;;  %vm60_vm1 = vcmask 261120   ;;  %s554_s1 = smov [#allocation7]  }
  0x28   :  { %407 = vmatprep.mubr.msk.f32.mxu0 %vm552_vm0, %v553_v1  ;;  %418 = vmatprep.mubr.msk.f32.mxu1 %vm552_vm0, %v553_v1  ;;  %v444_v5 = vpack.c.bf16 %v45_v3, %v44_v2  ;;  %v49_v6 = vld [vmem:[#allocation5 + $0x28] sm:$0xff]  ;;  %v47_v8 = vld [vmem:[#allocation5 + $0x18] sm:$0xff]  ;;  %v50_v10 = vld [vmem:[#allocation5 + $0x30] sm:$0xff]  ;;  %s362_s6 = sshll.u32 %s554_s1, 4  ;;  %s363_s6 = int_to_ptr.vmem [resolvable:$true] %s362_s6 }
  0x29   :  { %v450_v9 = vpack.c.bf16 %v49_v6, %v48_v4  ;;  %v51_v11 = vld [vmem:[#allocation5 + $0x38] sm:$0xff]  ;;  %v447_v12 = vpack.c.bf16 %v47_v8, %v46_v7  ;;  %v52_v14 = vld [vmem:[#allocation5 + $0x40] sm:$0xff]  ;;  %v53_v15 = vld [vmem:[#allocation5 + $0x48] sm:$0xff]  ;;  %s519_s7 = scalar_lea.vmem %s363_s6, 512  ;;  %p524_p3 = scmp.lt.s32.totalorder %s363_s6, %s363_s6 }
  0x2a   :  { %445 = vmatpush3.bf16.msra.mxu0 %v444_v5  ;;  %v453_v13 = vpack.c.bf16 %v51_v11, %v50_v10  ;;  %v56_v16 = vld [vmem:[#allocation5 + $0x60] sm:$0xff]  ;;  %v57_v17 = vld [vmem:[#allocation5 + $0x68] sm:$0xff]  ;;  %v456_v19 = vpack.c.bf16 %v53_v15, %v52_v14  ;;  %v54_v22 = vld [vmem:[#allocation5 + $0x50] sm:$0xff]  ;;  %p520_p2 = scmp.ne.s32.totalorder %s363_s6, %s519_s7  ;;  %p525_p4 = scmp.lt.s32.totalorder %s519_s7, %s519_s7 }
  0x2b   :  { %451 = vmatpush3.bf16.msra.mxu1 %v450_v9  ;;  %446 = vmatprep.subr.bf16.mxu0 %v551_v0  ;;  %v40_v18 = vld [vmem:[#allocation2] sm:$0xff]  ;;  %v41_v20 = vld [vmem:[#allocation2 + $0x8] sm:$0xff]  ;;  %v462_v21 = vpack.c.bf16 %v57_v17, %v56_v16  ;;  %v55_v23 = vld [vmem:[#allocation5 + $0x58] sm:$0xff] }
  0x2c   :  { %452 = vmatprep.subr.bf16.mxu1 %v551_v0  ;;  %v58_v24 = vld [vmem:[#allocation5 + $0x70] sm:$0xff]  ;;  %v59_v25 = vld [vmem:[#allocation5 + $0x78] sm:$0xff]  ;;  %v459_v26 = vpack.c.bf16 %v55_v23, %v54_v22  ;;  %p526_p5 = por %p525_p4, %p524_p3 }
  0x2d   :  { %v465_v27 = vpack.c.bf16 %v59_v25, %v58_v24  ;;  %v42_v28 = vld [vmem:[#allocation2 + $0x10] sm:$0xff]  ;;  %v43_v29 = vld [vmem:[#allocation2 + $0x18] sm:$0xff] }
  0x2e   :  { %448 = vmatpush3.bf16.msra.mxu0 %v447_v12  ;;  %p527_p6 = pnand %p526_p5, %p520_p2 }
  0x2f   :  { %454 = vmatpush3.bf16.msra.mxu1 %v453_v13  ;;  %455 = vmatprep.subr.bf16.mxu0 %v551_v0 }
  0x30   :  { %461 = vmatprep.subr.bf16.mxu1 %v551_v0 }
  0x31   :  { %408 = vmatmul.mubr.msk.f32.vlgmr.msra.gmra.mrb[0].mxu0 %vm60_vm1, %v40_v18 }
  0x32   :  { %419 = vmatmul.mubr.msk.f32.vlgmr.msra.gmra.mrb[0].mxu1 %vm60_vm1, %v41_v20  ;;  %457 = vmatpush3.bf16.msra.mxu0 %v456_v19 }
  0x33   :  { %463 = vmatpush3.bf16.msra.mxu1 %v462_v21  ;;  %458 = vmatprep.subr.bf16.mxu0 %v551_v0 }
  0x34   :  { %464 = vmatprep.subr.bf16.mxu1 %v551_v0  ;;  %429 = vmatprep.mubr.msk.f32.mxu0 %vm552_vm0, %v553_v1 }
  0x35   :  { %440 = vmatprep.mubr.msk.f32.mxu1 %vm552_vm0, %v553_v1 }
  0x36   :  { %460 = vmatpush3.bf16.msra.mxu0 %v459_v26 }
  0x37   :  { %466 = vmatpush3.bf16.msra.mxu1 %v465_v27 }
  0x39   :  { %430 = vmatmul.mubr.msk.f32.vlgmr.msra.gmra.mrb[2].mxu0 %vm60_vm1, %v42_v28 }
  0x3a   :  { %441 = vmatmul.mubr.msk.f32.vlgmr.msra.gmra.mrb[2].mxu1 %vm60_vm1, %v43_v29 }
 0x104   :  { %v130_v30 = vpop.f32.mrb[0].mxu0 }
 0x105   :  { %353 = vst.msk [vmem:[#allocation7] sm:$0xff] %vm60_vm1, %v130_v30  ;;  %v203_v31 = vpop.f32.mrb[0].mxu1  ;;  %v409_v32 = vpop.f32.mrb[1].mxu0 }
 0x106   :  { %354 = vst.msk [vmem:[#allocation7 + $0x8] sm:$0xff] %vm60_vm1, %v203_v31  ;;  %v420_v33 = vpop.f32.mrb[1].mxu1 }
 0x10c   :  { %v276_v34 = vpop.f32.mrb[2].mxu0 }
 0x10d   :  { %355 = vst.msk [vmem:[#allocation7 + $0x10] sm:$0xff] %vm60_vm1, %v276_v34  ;;  %v349_v35 = vpop.f32.mrb[2].mxu1  ;;  %v431_v36 = vpop.f32.mrb[3].mxu0 }
 0x10e   :  { %356 = vst.msk [vmem:[#allocation7 + $0x18] sm:$0xff] %vm60_vm1, %v349_v35  ;;  %v442_v37 = vpop.f32.mrb[3].mxu1 }
 0x10f   :  { %530 = shalt.err (!%p527_p6)
}
 0x110   :  { %s531_s10 = scalar_lea.hbm %s629_s2, 512 }
 0x111   :  { %p532_p7 = scmp.ne.s32.totalorder %s629_s2, %s531_s10  ;;  %p535_p8 = scmp.lt.u32.totalorder %s531_s10, %s629_s2 }
 0x113   :  { %p537_p9 = pnand %p535_p8, %p532_p7 }
 0x115   :  { %540 = shalt.err (!%p537_p9)
}
 0x116   :  { %368 = dma.vmem_to_hbm [thread:$0]  %s363_s6, 512, %s629_s2, [#allocation4], %s548_s19, %s548_s19, %s549_s20  }
 0x117   :  { %545 = dma.done.wait [#allocation4], 512  }
 0x118   :  { %546 = vsyncadd [#allocation4], 4294966784 }
 0x119   :  { %372 = vsyncpa [#allocation3], 1 }
 0x11a   :  { %373 = vsyncpa [#allocation6], 1 }
 0x11b   :  { %374 = vsyncpa [#allocation4], 1 }

</bundles_post_ra>
